<compile_context>
chip_gen: v5e
topology: v5e:2x2
jax: 0.10.0
libtpu: 0.0.40
codegen_flags: <defaults>
</compile_context>

<pallas_src>
import functools

import jax
import jax.numpy as jnp
import numpy as np
from jax.experimental import pallas as pl
from jax.experimental.pallas import tpu as pltpu

_LANE = 128     # last-dim alignment (lane width)
_SUBLANE = 8    # second-to-last-dim alignment (sublane width, f32)


def _round_up(x, m):
    return ((x + m - 1) // m) * m


def _choose_tb(batch, rp, target_m):
    """Batch elements per grid step.

    Targets ~target_m MXU rows per step, keeps >= 2 grid steps when batch >= 2
    (so the 'parallel' grid axis shards across v7x's two TensorCores), and picks
    a divisor of `batch` so no batch padding / output slice-copy is needed.
    """
    tb_cap = max(1, target_m // rp)
    if batch >= 2:
        tb_cap = min(tb_cap, max(1, batch // 2))
    tb = 1
    for d in range(1, min(tb_cap, batch) + 1):
        if batch % d == 0:
            tb = d
    return tb


def _encoder_kernel(x_ref, w_ref, b_ref, mean_ref, feat_ref, *,
                    n_regions, no_imgnorm, eps, approx_recip, compute_dtype):
    # x_ref:    (TB*Rp, Dp)   flattened image rows for TB batch elements (native dtype)
    # w_ref:    (Dp, Ep)      pre-transposed Linear weight (constant across grid)
    # b_ref:    (1, Ep)       bias, f32 (constant across grid)
    # mean_ref: (1, TB, Ep)   output block: feat_local.mean(1) for this batch group
    # feat_ref: (TB, Rp, Ep)  output block: feat_local
    tb, rp, ep = feat_ref.shape

    x = x_ref[...]
    if x.dtype != compute_dtype:
        x = x.astype(compute_dtype)         # in-register cast, hides under the MXU

    # Single MXU matmul with M = TB*Rp rows; f32 accumulation.
    feat = jnp.dot(x, w_ref[...], preferred_element_type=jnp.float32)
    feat = feat + b_ref[...]                                        # (TB*Rp, Ep) f32

    if not no_imgnorm:
        # l2norm along last dim: X / (sqrt(sum(X^2)) + eps)   (all in f32)
        norm = jnp.sqrt(jnp.sum(feat * feat, axis=-1, keepdims=True)) + eps
        if approx_recip:
            feat = feat * pl.reciprocal(norm, approx=True)          # EUP slot
        else:
            feat = feat / norm                                      # exact f32 path

    feat3 = feat.reshape(tb, rp, ep)                                # split leading dim only
    feat_ref[...] = feat3.astype(feat_ref.dtype)

    # Mean over the *true* regions only (padded region rows excluded via mask,
    # not a partial-sublane slice).
    if n_regions == rp:
        region_sum = jnp.sum(feat3, axis=1)
    else:
        row_id = jax.lax.broadcasted_iota(jnp.int32, (tb, rp, ep), 1)
        region_sum = jnp.sum(jnp.where(row_id < n_regions, feat3, 0.0), axis=1)
    mean = region_sum * (1.0 / n_regions)
    mean_ref[...] = mean[None].astype(mean_ref.dtype)


def prepare_params(weight, bias, *, use_bf16=True):
    """One-time parameter prep: transpose, pad to lane width, cast.

    weight: (E, D) PyTorch Linear layout; bias: (E,).
    """
    E, D = weight.shape
    Dp = _round_up(D, _LANE)
    Ep = _round_up(E, _LANE)

    w_t = jnp.transpose(weight)                               # (D, E)
    if (Dp, Ep) != (D, E):
        w_t = jnp.pad(w_t, ((0, Dp - D), (0, Ep - E)))
    w_t = w_t.astype(jnp.bfloat16 if use_bf16 else weight.dtype)

    b2 = bias.astype(jnp.float32)
    if Ep != E:
        b2 = jnp.pad(b2, (0, Ep - E))
    b2 = b2.reshape(1, Ep)

    return {"w_t": w_t, "b2": b2, "img_dim": D, "embed_size": E,
            "use_bf16": use_bf16}


def _pallas_forward(x2d, w_t, b2, *, kernel, B, G, TB, Rp, Dp, Ep,
                    mean_dtype, feat_dtype, vmem_limit_bytes, single_buffer_params):
    m_rows = TB * Rp
    const_kwargs = dict(pipeline_mode=pl.Buffered(1)) if single_buffer_params else {}
    return pl.pallas_call(
        kernel,
        out_shape=(
            jax.ShapeDtypeStruct((G, TB, Ep), mean_dtype),
            jax.ShapeDtypeStruct((B, Rp, Ep), feat_dtype),
        ),
        grid_spec=pltpu.PrefetchScalarGridSpec(
            num_scalar_prefetch=0,
            grid=(G,),
            in_specs=[
                pl.BlockSpec((m_rows, Dp), lambda g: (g, 0)),            # image rows
                pl.BlockSpec((Dp, Ep), lambda g: (0, 0), **const_kwargs),  # weight
                pl.BlockSpec((1, Ep), lambda g: (0, 0), **const_kwargs),   # bias
            ],
            out_specs=[
                pl.BlockSpec((1, TB, Ep), lambda g: (g, 0, 0)),
                pl.BlockSpec((TB, Rp, Ep), lambda g: (g, 0, 0)),
            ],
        ),
        compiler_params=pltpu.CompilerParams(
            dimension_semantics=("parallel",),      # sharded across v7x's 2 TCs
            vmem_limit_bytes=vmem_limit_bytes,      # fits v7x's 64 MiB/TC
        ),
    )(x2d, w_t, b2)


def encoder_image_precomp(images, params, *, no_imgnorm=False, eps=1e-8,
                          approx_recip=None, target_m=512,
                          vmem_limit_bytes=48 * 1024 * 1024, feat_dtype=None):
    """images: (B, R, D); params from prepare_params(weight, bias).

    Returns (feat_mean, feat_local) matching EncoderImagePrecomp.forward:
      feat_mean:  (B, E)
      feat_local: (B, R, E)
    """
    B, R, D = images.shape
    E = params["embed_size"]
    assert D == params["img_dim"], "image feature dim does not match weights"
    w_t, b2 = params["w_t"], params["b2"]
    Dp, Ep = w_t.shape
    Rp = _round_up(R, _SUBLANE)

    out_dtype = images.dtype
    if feat_dtype is None:
        feat_dtype = out_dtype              # v5e tip: pass jnp.bfloat16 to halve stores
    if approx_recip is None:
        approx_recip = params["use_bf16"]

    TB = _choose_tb(B, Rp, target_m)
    G = B // TB

    # Pad only when needed; images stay in their native dtype (cast happens in-kernel).
    x = images
    if (Rp, Dp) != (R, D):
        x = jnp.pad(x, ((0, 0), (0, Rp - R), (0, Dp - D)))
    x2d = x.reshape(B * Rp, Dp)

    kernel = functools.partial(
        _encoder_kernel,
        n_regions=R, no_imgnorm=no_imgnorm, eps=eps,
        approx_recip=approx_recip, compute_dtype=w_t.dtype)

    call = functools.partial(
        _pallas_forward, x2d, w_t, b2, kernel=kernel, B=B, G=G, TB=TB,
        Rp=Rp, Dp=Dp, Ep=Ep, mean_dtype=out_dtype, feat_dtype=feat_dtype,
        vmem_limit_bytes=vmem_limit_bytes)
    try:
        mean_out, feat_out = call(single_buffer_params=True)
    except Exception:
        # TODO(synk): pl.Buffered(1) single-buffering unsupported on this jax build;
        # fall back to default double-buffered constant operands.
        mean_out, feat_out = call(single_buffer_params=False)

    # (G, TB, Ep) -> (B, Ep): contiguous reshape (B == G * TB, no batch padding).
    mean_out = mean_out.reshape(B, Ep)
    if Ep != E:
        mean_out = mean_out[:, :E]
    if (Rp, Ep) != (R, E):
        feat_out = feat_out[:, :R, :E]
    return mean_out, feat_out


def init_params(img_dim, embed_size, key):
    """Xavier-uniform init matching EncoderImagePrecomp.init_weights."""
    r = np.sqrt(6.0) / np.sqrt(img_dim + embed_size)
    weight = jax.random.uniform(
        key, (embed_size, img_dim), minval=-r, maxval=r, dtype=jnp.float32
    )
    bias = jnp.zeros((embed_size,), dtype=jnp.float32)
    return weight, bias


def reference_forward(images, weight, bias, no_imgnorm=False, eps=1e-8):
    feat = jnp.einsum("brd,ed->bre", images, weight) + bias
    if not no_imgnorm:
        norm = jnp.sqrt(jnp.sum(feat * feat, axis=-1, keepdims=True)) + eps
        feat = feat / norm
    return feat.mean(axis=1), feat


if __name__ == "__main__":
    B, R, img_dim, embed_size = 2, 8, 32, 32

    key = jax.random.PRNGKey(0)
    k_img, k_w = jax.random.split(key)
    images = jax.random.normal(k_img, (B, R, img_dim), dtype=jnp.float32)
    weight, bias = init_params(img_dim, embed_size, k_w)

    ref_mean, ref_local = reference_forward(images, weight, bias)

    # Exact f32 path: tight tolerance.
    params_f32 = prepare_params(weight, bias, use_bf16=False)
    mean32, feat32 = encoder_image_precomp(images, params_f32)
    jax.block_until_ready((mean32, feat32))
    np.testing.assert_allclose(np.asarray(feat32), np.asarray(ref_local),
                               rtol=1e-5, atol=1e-5)
    np.testing.assert_allclose(np.asarray(mean32), np.asarray(ref_mean),
                               rtol=1e-5, atol=1e-5)

    # Fast path (bf16 MXU operands + EUP approx reciprocal): looser tolerance.
    params_bf16 = prepare_params(weight, bias, use_bf16=True)
    meanbf, featbf = encoder_image_precomp(images, params_bf16)
    jax.block_until_ready((meanbf, featbf))
    np.testing.assert_allclose(np.asarray(featbf), np.asarray(ref_local),
                               rtol=2e-2, atol=2e-2)
    np.testing.assert_allclose(np.asarray(meanbf), np.asarray(ref_mean),
                               rtol=2e-2, atol=2e-2)

    print("KERNEL_OK")
</pallas_src>

<mosaic_0001>
module attributes {stable_mosaic.version = 11 : i64} {
  func.func @_encoder_kernel(%arg0: i32, %arg1: memref<8x128xf32, #tpu.memory_space<vmem>>, %arg2: memref<128x128xf32, #tpu.memory_space<vmem>>, %arg3: memref<1x128xf32, #tpu.memory_space<vmem>>, %arg4: memref<1x1x128xf32, #tpu.memory_space<vmem>>, %arg5: memref<1x8x128xf32, #tpu.memory_space<vmem>>) attributes {dimension_semantics = [#tpu.dimension_semantics<parallel>], iteration_bounds = array<i64: 2>, scalar_prefetch = 0 : i64, scratch_operands = 0 : i64, tpu.core_type = #tpu.core_type<tc>, window_params = [{transform_indices = @transform_0, window_bounds = array<i64: 8, 128>}, {pipeline_mode = #tpu.pipeline_mode<synchronous>, transform_indices = @transform_1, window_bounds = array<i64: 128, 128>}, {pipeline_mode = #tpu.pipeline_mode<synchronous>, transform_indices = @transform_2, window_bounds = array<i64: 1, 128>}, {transform_indices = @transform_3, window_bounds = array<i64: 1, 1, 128>}, {transform_indices = @transform_4, window_bounds = array<i64: 1, 8, 128>}]} {
    %c0 = arith.constant 0 : index
    %c0_0 = arith.constant 0 : index
    %0 = vector.load %arg1[%c0, %c0_0] : memref<8x128xf32, #tpu.memory_space<vmem>>, vector<8x128xf32>
    %c0_1 = arith.constant 0 : index
    %c0_2 = arith.constant 0 : index
    %1 = vector.load %arg2[%c0_1, %c0_2] : memref<128x128xf32, #tpu.memory_space<vmem>>, vector<128x128xf32>
    %cst = arith.constant dense<0.000000e+00> : vector<8x128xf32>
    %2 = tpu.matmul %0, %1, %cst {dimension_numbers = #tpu.dot_dimension_numbers<[1], [0], [0], [1], [0, 0, 1, 1], [], []>} : vector<8x128xf32>, vector<128x128xf32>, vector<8x128xf32> -> vector<8x128xf32>
    %c0_3 = arith.constant 0 : index
    %c0_4 = arith.constant 0 : index
    %3 = vector.load %arg3[%c0_3, %c0_4] : memref<1x128xf32, #tpu.memory_space<vmem>>, vector<1x128xf32>
    %4 = vector.broadcast %3 : vector<1x128xf32> to vector<8x128xf32>
    %5 = arith.addf %2, %4 : vector<8x128xf32>
    %6 = arith.mulf %5, %5 : vector<8x128xf32>
    %cst_5 = arith.constant dense<0.000000e+00> : vector<8xf32>
    %7 = vector.multi_reduction <add>, %6, %cst_5 [1] : vector<8x128xf32> to vector<8xf32>
    %8 = vector.shape_cast %7 : vector<8xf32> to vector<8x1xf32>
    %9 = math.sqrt %8 : vector<8x1xf32>
    %cst_6 = arith.constant 9.99999993E-9 : f32
    %10 = vector.broadcast %cst_6 : f32 to vector<8x1xf32>
    %11 = arith.addf %9, %10 : vector<8x1xf32>
    %12 = vector.broadcast %11 : vector<8x1xf32> to vector<8x128xf32>
    %13 = arith.divf %5, %12 : vector<8x128xf32>
    %14 = vector.shape_cast %13 : vector<8x128xf32> to vector<1x8x128xf32>
    %c0_7 = arith.constant 0 : index
    %c0_8 = arith.constant 0 : index
    %c0_9 = arith.constant 0 : index
    %15 = vector.load %arg5[%c0_7, %c0_8, %c0_9] : memref<1x8x128xf32, #tpu.memory_space<vmem>>, vector<1x8x128xf32>
    tpu.vector_store %arg5[%c0_7, %c0_8, %c0_9], %14 {strides = array<i32>} : memref<1x8x128xf32, #tpu.memory_space<vmem>>, vector<1x8x128xf32>,
    %cst_10 = arith.constant dense<0.000000e+00> : vector<1x128xf32>
    %16 = vector.multi_reduction <add>, %14, %cst_10 [1] : vector<1x8x128xf32> to vector<1x128xf32>
    %cst_11 = arith.constant 1.250000e-01 : f32
    %17 = vector.broadcast %cst_11 : f32 to vector<1x128xf32>
    %18 = arith.mulf %16, %17 : vector<1x128xf32>
    %19 = vector.shape_cast %18 : vector<1x128xf32> to vector<1x1x128xf32>
    %c0_12 = arith.constant 0 : index
    %c0_13 = arith.constant 0 : index
    %c0_14 = arith.constant 0 : index
    %20 = vector.load %arg4[%c0_12, %c0_13, %c0_14] : memref<1x1x128xf32, #tpu.memory_space<vmem>>, vector<1x1x128xf32>
    tpu.vector_store %arg4[%c0_12, %c0_13, %c0_14], %19 {strides = array<i32>} : memref<1x1x128xf32, #tpu.memory_space<vmem>>, vector<1x1x128xf32>,
    return
  }
  func.func @transform_0(%arg0: i32) -> (i32, i32) {
    %c0_i32 = arith.constant 0 : i32
    %c0_i32_0 = arith.constant 0 : i32
    return %arg0, %c0_i32 : i32, i32
  }
  func.func @transform_1(%arg0: i32) -> (i32, i32) {
    %c0_i32 = arith.constant 0 : i32
    %c0_i32_0 = arith.constant 0 : i32
    %c0_i32_1 = arith.constant 0 : i32
    return %c0_i32, %c0_i32_0 : i32, i32
  }
  func.func @transform_2(%arg0: i32) -> (i32, i32) {
    %c0_i32 = arith.constant 0 : i32
    %c0_i32_0 = arith.constant 0 : i32
    %c0_i32_1 = arith.constant 0 : i32
    return %c0_i32, %c0_i32_0 : i32, i32
  }
  func.func @transform_3(%arg0: i32) -> (i32, i32, i32) {
    %c0_i32 = arith.constant 0 : i32
    %c0_i32_0 = arith.constant 0 : i32
    %c0_i32_1 = arith.constant 0 : i32
    return %arg0, %c0_i32, %c0_i32_0 : i32, i32, i32
  }
  func.func @transform_4(%arg0: i32) -> (i32, i32, i32) {
    %c0_i32 = arith.constant 0 : i32
    %c0_i32_0 = arith.constant 0 : i32
    %c0_i32_1 = arith.constant 0 : i32
    return %arg0, %c0_i32, %c0_i32_0 : i32, i32, i32
  }
}

module attributes {stable_mosaic.version = 11 : i64} {
  func.func @_encoder_kernel(%arg0: i32, %arg1: memref<8x128xf32, #tpu.memory_space<vmem>>, %arg2: memref<128x128xf32, #tpu.memory_space<vmem>>, %arg3: memref<1x128xf32, #tpu.memory_space<vmem>>, %arg4: memref<1x1x128xf32, #tpu.memory_space<vmem>>, %arg5: memref<1x8x128xf32, #tpu.memory_space<vmem>>) attributes {dimension_semantics = [#tpu.dimension_semantics<parallel>], iteration_bounds = array<i64: 2>, scalar_prefetch = 0 : i64, scratch_operands = 0 : i64, tpu.core_type = #tpu.core_type<tc>, window_params = [{transform_indices = @transform_0, window_bounds = array<i64: 8, 128>}, {pipeline_mode = #tpu.pipeline_mode<synchronous>, transform_indices = @transform_1, window_bounds = array<i64: 128, 128>}, {pipeline_mode = #tpu.pipeline_mode<synchronous>, transform_indices = @transform_2, window_bounds = array<i64: 1, 128>}, {transform_indices = @transform_3, window_bounds = array<i64: 1, 1, 128>}, {transform_indices = @transform_4, window_bounds = array<i64: 1, 8, 128>}]} {
    %c0 = arith.constant 0 : index
    %c0_0 = arith.constant 0 : index
    %0 = vector.load %arg1[%c0, %c0_0] : memref<8x128xf32, #tpu.memory_space<vmem>>, vector<8x128xf32>
    %c0_1 = arith.constant 0 : index
    %c0_2 = arith.constant 0 : index
    %1 = vector.load %arg2[%c0_1, %c0_2] : memref<128x128xf32, #tpu.memory_space<vmem>>, vector<128x128xf32>
    %cst = arith.constant dense<0.000000e+00> : vector<8x128xf32>
    %2 = tpu.matmul %0, %1, %cst {dimension_numbers = #tpu.dot_dimension_numbers<[1], [0], [0], [1], [0, 0, 1, 1], [], []>} : vector<8x128xf32>, vector<128x128xf32>, vector<8x128xf32> -> vector<8x128xf32>
    %c0_3 = arith.constant 0 : index
    %c0_4 = arith.constant 0 : index
    %3 = vector.load %arg3[%c0_3, %c0_4] : memref<1x128xf32, #tpu.memory_space<vmem>>, vector<1x128xf32>
    %4 = vector.broadcast %3 : vector<1x128xf32> to vector<8x128xf32>
    %5 = arith.addf %2, %4 : vector<8x128xf32>
    %6 = arith.mulf %5, %5 : vector<8x128xf32>
    %cst_5 = arith.constant dense<0.000000e+00> : vector<8xf32>
    %7 = vector.multi_reduction <add>, %6, %cst_5 [1] : vector<8x128xf32> to vector<8xf32>
    %8 = vector.shape_cast %7 : vector<8xf32> to vector<8x1xf32>
    %9 = math.sqrt %8 : vector<8x1xf32>
    %cst_6 = arith.constant 9.99999993E-9 : f32
    %10 = vector.broadcast %cst_6 : f32 to vector<8x1xf32>
    %11 = arith.addf %9, %10 : vector<8x1xf32>
    %12 = vector.broadcast %11 : vector<8x1xf32> to vector<8x128xf32>
    %13 = arith.divf %5, %12 : vector<8x128xf32>
    %14 = vector.shape_cast %13 : vector<8x128xf32> to vector<1x8x128xf32>
    %c0_7 = arith.constant 0 : index
    %c0_8 = arith.constant 0 : index
    %c0_9 = arith.constant 0 : index
    %15 = vector.load %arg5[%c0_7, %c0_8, %c0_9] : memref<1x8x128xf32, #tpu.memory_space<vmem>>, vector<1x8x128xf32>
    tpu.vector_store %arg5[%c0_7, %c0_8, %c0_9], %14 {strides = array<i32>} : memref<1x8x128xf32, #tpu.memory_space<vmem>>, vector<1x8x128xf32>,
    %cst_10 = arith.constant dense<0.000000e+00> : vector<1x128xf32>
    %16 = vector.multi_reduction <add>, %14, %cst_10 [1] : vector<1x8x128xf32> to vector<1x128xf32>
    %cst_11 = arith.constant 1.250000e-01 : f32
    %17 = vector.broadcast %cst_11 : f32 to vector<1x128xf32>
    %18 = arith.mulf %16, %17 : vector<1x128xf32>
    %19 = vector.shape_cast %18 : vector<1x128xf32> to vector<1x1x128xf32>
    %c0_12 = arith.constant 0 : index
    %c0_13 = arith.constant 0 : index
    %c0_14 = arith.constant 0 : index
    %20 = vector.load %arg4[%c0_12, %c0_13, %c0_14] : memref<1x1x128xf32, #tpu.memory_space<vmem>>, vector<1x1x128xf32>
    tpu.vector_store %arg4[%c0_12, %c0_13, %c0_14], %19 {strides = array<i32>} : memref<1x1x128xf32, #tpu.memory_space<vmem>>, vector<1x1x128xf32>,
    return
  }
  func.func @transform_0(%arg0: i32) -> (i32, i32) {
    %c0_i32 = arith.constant 0 : i32
    %c0_i32_0 = arith.constant 0 : i32
    return %arg0, %c0_i32 : i32, i32
  }
  func.func @transform_1(%arg0: i32) -> (i32, i32) {
    %c0_i32 = arith.constant 0 : i32
    %c0_i32_0 = arith.constant 0 : i32
    %c0_i32_1 = arith.constant 0 : i32
    return %c0_i32, %c0_i32_0 : i32, i32
  }
  func.func @transform_2(%arg0: i32) -> (i32, i32) {
    %c0_i32 = arith.constant 0 : i32
    %c0_i32_0 = arith.constant 0 : i32
    %c0_i32_1 = arith.constant 0 : i32
    return %c0_i32, %c0_i32_0 : i32, i32
  }
  func.func @transform_3(%arg0: i32) -> (i32, i32, i32) {
    %c0_i32 = arith.constant 0 : i32
    %c0_i32_0 = arith.constant 0 : i32
    %c0_i32_1 = arith.constant 0 : i32
    return %arg0, %c0_i32, %c0_i32_0 : i32, i32, i32
  }
  func.func @transform_4(%arg0: i32) -> (i32, i32, i32) {
    %c0_i32 = arith.constant 0 : i32
    %c0_i32_0 = arith.constant 0 : i32
    %c0_i32_1 = arith.constant 0 : i32
    return %arg0, %c0_i32, %c0_i32_0 : i32, i32, i32
  }
}

</mosaic_0001>

<bundles_post_ra>
// kernel: tpu_custom_call.1
= control target key start
LH: loop header
LB: loop body
LE: loop exit
PB: predicated region body
PF: predicated region fallthrough
CT: control target
= control target key end

     0   :  { %10 = vsyncpa [#allocation3], 0  ;;  %s901_s0 = inlined_call_operand.hbm [shape: f32[16,128], index: 0, kind: input, shape index: {}]   ;;  %s902_s1 = inlined_call_operand.hbm [shape: f32[128,128], index: 1, kind: input, shape index: {}]   ;;  %s903_s2 = inlined_call_operand.vmem [shape: f32[1,128], index: 2, kind: input, shape index: {}]   ;;  %s904_s3 = inlined_call_operand.hbm [shape: f32[2,1,128], index: 3, kind: output, shape index: {0}]   ;;  %s905_s4 = inlined_call_operand.hbm [shape: f32[2,8,128], index: 4, kind: output, shape index: {1}]  }
   0x1   :  { %12 = vsyncpa [#allocation3 + $0x1], 0 }
   0x2   :  { %13 = vsyncpa [#allocation6], 0 }
   0x3   :  { %14 = vsyncpa [#allocation4], 0 }
   0x4   :  { %16 = vsyncpa [#allocation4 + $0x1], 0 }
   0x5   :  { %17 = vsyncpa [#allocation9], 0 }
   0x6   :  { %19 = vsyncpa [#allocation9 + $0x1], 0  ;;  %s739_s15 = smov 0   ;;  %s741_s16 = smov 0  }
   0x7   :  { %s743_s17 = smov 0   ;;  %s745_s18 = smov 0  }
   0x8 LB: > { %s161_s21 = sshll.u32 %s902_s1, 4  ;;  %s763_s22 = sadd.s32 4294967295, %s709_s18   ;;  %s709_s18 = sphi %s745_s18, %s915_s18   ;;  %s705_s17 = sphi %s743_s17, %s914_s17   ;;  %s701_s16 = sphi %s741_s16, %s913_s16   ;;  %s697_s15 = sphi %s739_s15, %s912_s15   ;;  %s162_s21 = int_to_ptr.hbm [resolvable:$true] %s161_s21 }
   0x9   : > { %p465_p0 = scmp.ge.s32.totalorder %s709_s18, 1  ;;  %p46_p1 = scmp.eq.s32.totalorder %s763_s22, 0 }
   0xa   : > { %p150_p2 = scmp.lt.s32.totalorder %s709_s18, 3  ;;  %s711_s24 = smov [#allocation5]  }
   0xb   : > { %s163_s25 = sshll.u32 %s711_s24, 4  ;;  %s712_s26 = smov 128   ;;  %s164_s25 = int_to_ptr.vmem [resolvable:$true] %s163_s25 }
   0xc   : > { %p768_p3 = pnand %p465_p0, %p150_p2  ;;  %s713_s27 = smov 8  }
   0xd   : > { %s464_s28 = sadd.s32 4294967294, %s709_s18   ;;  %s779_s29 = sadd.s32 1, %s709_s18  }
   0xe   : > { %p488_p4 = pneg %p768_p3  ;;  %s32_s30 = sadd.s32 1, %s705_s17 }
   0xf   : > { %s29_s5 = ssub.s32 %s709_s18, %s779_s29  ;;  %p39_p7 = scmp.ne.s32.totalorder %s705_s17, %s701_s16 }
  0x10   : > { %p489_p6 = pnand %p488_p4, %p46_p1  ;;  %p30_p8 = scmp.eq.s32.totalorder %s29_s5, 0 }
  0x11   : > { %p40_p9 = scmp.eq.s32.totalorder %s709_s18, 0  ;;  %p45_p10 = scmp.ne.s32.totalorder %s701_s16, %s697_s15 }
  0x12   : > { %491 = dma.hbm_to_vmem [thread:$0]  (!%p489_p6), %s162_s21, 2048, %s164_s25, [#allocation6], %s712_s26, %s712_s26, %s713_s27  }
  0x13   : > { %p111_p11 = scmp.eq.s32.totalorder %s763_s22, 1  ;;  %p795_p12 = por %p46_p1, %p45_p10 }
  0x14   : > { %s791_s6 = scalar_select %p30_p8, %s705_s17, %s32_s30  }
  0x15   : > { %p799_p13 = por %p111_p11, %p39_p7  ;;  %p117_p0 = scmp.eq.s32.totalorder %s464_s28, 1 }
  0x16   : > { %p41_p2 = por %p40_p9, %p39_p7  ;;  %s180_s9 = sand.u32 1, %s705_s17  }
  0x17   : > { %p804_p4 = por %p117_p0, %p45_p10  ;;  %p504_p6 = scmp.lt.s32.totalorder %s709_s18, 2 }
  0x18   : > { %s468_s11 = sshll.u32 %s180_s9, 3  ;;  %s469_s12 = sshll.u32 %s709_s18, 3 }
  0x19   : > { %s188_s19 = scalar_lea.hbm %s901_s0, %s469_s12  ;;  %s184_s21 = scalar_lea.vmem [#allocation2], %s468_s11 }
  0x1a   : > { %s190_s20 = sshll.u32 %s188_s19, 4  ;;  %s192_s24 = sshll.u32 %s184_s21, 4  ;;  %s191_s20 = int_to_ptr.hbm [resolvable:$true] %s190_s20  ;;  %s193_s24 = int_to_ptr.vmem [resolvable:$true] %s192_s24 }
  0x1b   : > { %p813_p8 = pnand %p504_p6, %p41_p2  ;;  %s181_s26 = scalar_lea.sflag [#allocation3], %s180_s9 }
  0x1c   : > { %s577_s27 = sshra.s32 %s191_s20, 4  ;;  %s584_s11 = scalar_lea.hbm %s901_s0, 16  ;;  %s578_s27 = int_to_ptr.hbm [resolvable:$true] %s577_s27 }
  0x1d   : > { %s579_s28 = scalar_lea.hbm %s578_s27, 8  ;;  %p581_p9 = pneg %p813_p8 }
  0x1e   : > { %p580_p7 = scmp.ne.s32.totalorder %s578_s27, %s579_s28  ;;  %p585_p0 = scmp.lt.s32.totalorder %s578_s27, %s901_s0 }
  0x1f   : > { %p586_p2 = scmp.lt.s32.totalorder %s584_s11, %s579_s28 }
  0x20   : > { %p582_p10 = pnand %p581_p9, %p580_p7 }
  0x21   : > { %p587_p6 = por %p586_p2, %p585_p0 }
  0x22   : > { %p583_p11 = pneg %p582_p10 }
  0x24   : > { %p588_p5 = pnand %p587_p6, %p583_p11 }
  0x26   : > { %591 = shalt.err (!%p588_p5)
}
  0x27   : > { %495 = dma.hbm_to_vmem [thread:$0]  (!%p813_p8), %s191_s20, 128, %s193_s24, %s181_s26  }
  0x28   : > { %201 = sbr.rel (%p768_p3) target bundleno = 385 (0x181), region = 32  ;;  %s830_s9 = sand.u32 (!%p768_p3), 1, %s701_s16  }
  0x29   : > { %s471_s14 = sshll.u32 (!%p768_p3), %s830_s9, 3  ;;  %s204_s19 = scalar_lea.sflag (!%p768_p3), [#allocation3], %s830_s9 }
  0x2a   : > { %s836_s21 = scalar_lea.vmem (!%p768_p3), [#allocation2], %s471_s14 }
  0x2d   : > { %680 = dma.done.wait (%p795_p12), %s204_s19, 128  }
  0x2e   : > { %682 = vsyncadd (%p795_p12), %s204_s19, 4294967168 }
  0x2f   : > { %684 = dma.done.wait (%p46_p1), [#allocation6], 2048  }
  0x30   : > { %686 = vsyncadd (%p46_p1), [#allocation6], 4294965248  ;;  %v258_v0 = vld [vmem:[#allocation5 + $0x78] sm:$0xff]  ;;  %v257_v1 = vld [vmem:[#allocation5 + $0x70] sm:$0xff]  ;;  %s475_s20 = sshll.u32 %s763_s22, 3  ;;  %s241_s27 = scalar_lea.vmem [#allocation8], %s471_s14 }
  0x31   : > { %263 = vmatpush.msra.mxu0 %v258_v0  ;;  %v256_v2 = vld [vmem:[#allocation5 + $0x68] sm:$0xff]  ;;  %v255_v3 = vld [vmem:[#allocation5 + $0x60] sm:$0xff]  ;;  %v254_v4 = vld [vmem:[#allocation5 + $0x58] sm:$0xff]  ;;  %s351_s26 = scalar_lea.hbm %s905_s4, %s475_s20  ;;  %s353_s28 = sshll.u32 %s241_s27, 4  ;;  %s354_s28 = int_to_ptr.vmem [resolvable:$true] %s353_s28 }
  0x32   : > { %v253_v5 = vld [vmem:[#allocation5 + $0x50] sm:$0xff]  ;;  %v252_v6 = vld [vmem:[#allocation5 + $0x48] sm:$0xff]  ;;  %v251_v7 = vld [vmem:[#allocation5 + $0x40] sm:$0xff]  ;;  %s355_s30 = sshll.u32 %s351_s26, 4  ;;  %s328_s5 = scalar_lea.sflag [#allocation9], %s830_s9  ;;  %s356_s30 = int_to_ptr.hbm [resolvable:$true] %s355_s30 }
  0x33   : > { %264 = vmatpush.msra.mxu0 %v257_v1  ;;  %v250_v8 = vld [vmem:[#allocation5 + $0x38] sm:$0xff]  ;;  %v249_v9 = vld [vmem:[#allocation5 + $0x30] sm:$0xff]  ;;  %v248_v10 = vld [vmem:[#allocation5 + $0x28] sm:$0xff]  ;;  %s621_s11 = sshra.s32 %s356_s30, 4  ;;  %s627_s19 = scalar_lea.hbm %s905_s4, 16  ;;  %s622_s11 = int_to_ptr.hbm [resolvable:$true] %s621_s11 }
  0x34   : > { %v247_v11 = vld [vmem:[#allocation5 + $0x20] sm:$0xff]  ;;  %v246_v12 = vld [vmem:[#allocation5 + $0x18] sm:$0xff]  ;;  %v245_v13 = vld [vmem:[#allocation5 + $0x10] sm:$0xff]  ;;  %s623_s12 = scalar_lea.hbm %s622_s11, 8  ;;  %p628_p12 = scmp.lt.s32.totalorder %s622_s11, %s905_s4 }
  0x35   : > { %265 = vmatpush.msra.mxu0 %v256_v2  ;;  %v244_v14 = vld [vmem:[#allocation5 + $0x8] sm:$0xff]  ;;  %v243_v15 = vld [vmem:[#allocation5] sm:$0xff]  ;;  %v242_v16 = vld [vmem:[%s836_s21] sm:$0xff]  ;;  %p624_p1 = scmp.ne.s32.totalorder %s622_s11, %s623_s12  ;;  %p629_p8 = scmp.lt.s32.totalorder %s627_s19, %s623_s12 }
  0x36   : > { %v542_v17 = vld [vmem:[%s903_s2] ss:$0 sm:$0xff] }
  0x37   : > { %266 = vmatpush.msra.mxu0 %v255_v3  ;;  %p625_p3 = pnand %p624_p1, %p799_p13  ;;  %p630_p7 = por %p629_p8, %p628_p12 }
  0x39   : > { %267 = vmatpush.msra.mxu0 %v254_v4  ;;  %p626_p5 = pneg %p625_p3 }
  0x3b   : > { %268 = vmatpush.msra.mxu0 %v253_v5  ;;  %p631_p9 = pnand %p630_p7, %p626_p5 }
  0x3d   : > { %269 = vmatpush.msra.mxu0 %v252_v6 }
  0x3f   : > { %270 = vmatpush.msra.mxu0 %v251_v7 }
  0x41   : > { %271 = vmatpush.msra.mxu0 %v250_v8 }
  0x43   : > { %272 = vmatpush.msra.mxu0 %v249_v9 }
  0x45   : > { %273 = vmatpush.msra.mxu0 %v248_v10 }
  0x47   : > { %274 = vmatpush.msra.mxu0 %v247_v11 }
  0x49   : > { %275 = vmatpush.msra.mxu0 %v246_v12 }
  0x4b   : > { %276 = vmatpush.msra.mxu0 %v245_v13 }
  0x4d   : > { %277 = vmatpush.msra.mxu0 %v244_v14 }
  0x4f   : > { %278 = vmatpush.msra.mxu0 %v243_v15 }
  0x50   : > { %279 = vmatmul.f32.vlgmr.msra.gmra.mxu0 %v242_v16 }
  0xcd   : > { %v280_v18 = vpop.f32.mrf.mxu0 }
  0xce   : > { %v281_v19 = vadd.f32 %v542_v17, %v280_v18 }
  0xd0   : > { %v283_v20 = vmul.f32 %v281_v19, %v281_v19 }
  0xd2   : > { %284 = vadd.xlane.f32.xlu0 %v283_v20 }
 0x145   : > { %v285_v21 = vpop.xlane.xlu0 %284 }
 0x146   : > { %543 = vrsqrt.f32 %v285_v21  ;;  %vm293_vm0 = vcmp.eq.f32.partialorder %v285_v21, inf  ;;  %v296_v29 = vand.u32 2147483648, %v285_v21  ;;  %vm295_vm1 = vcmp.eq.f32.partialorder %v285_v21, 0.0 }
 0x14c   : > { %v544_v22 = vpop.eup %543 }
 0x14d   : > { %v287_v23 = vmul.f32 %v544_v22, %v285_v21 }
 0x14f   : > { %v288_v24 = vmul.f32 %v544_v22, %v287_v23 }
 0x151   : > { %v289_v25 = vmul.f32 0.5, %v288_v24 }
 0x153   : > { %v290_v26 = vsub.f32 1.5, %v289_v25 }
 0x155   : > { %v291_v27 = vmul.f32 %v544_v22, %v290_v26 }
 0x157   : > { %v292_v28 = vmul.f32 %v291_v27, %v285_v21 }
 0x159   : > { %v294_v30 = vsel %vm293_vm0, %v285_v21, %v292_v28 }
 0x15a   : > { %v297_v31 = vsel %vm295_vm1, %v296_v29, %v294_v30 }
 0x15b   : > { %v298_v32 = vadd.f32 1e-08, %v297_v31 }
 0x15d   : > { %545 = vrcp.f32 %v298_v32  ;;  %v310_v36 = vand.u32 2147483648, %v298_v32  ;;  %v308_v38 = vand.u32 2147483647, %v298_v32  ;;  %vm304_vm3 = vweird.f32 %v298_v32 }
 0x15f   : > { %v311_v40 = vor.u32 1.1754944e-38, %v310_v36  ;;  %vm309_vm5 = vcmp.eq.f32.partialorder %v308_v38, 8.507059e+37 }
 0x163   : > { %v546_v33 = vpop.eup %545 }
 0x164   : > { %v300_v34 = vmul.f32 %v546_v33, %v298_v32  ;;  %vm305_vm2 = vweird.f32 %v546_v33 }
 0x165   : > { %vm306_vm4 = vmor %vm304_vm3, %vm305_vm2 }
 0x166   : > { %v301_v35 = vsub.f32 1.0, %v300_v34 }
 0x168   : > { %v302_v37 = vmul.f32 %v546_v33, %v301_v35 }
 0x16a   : > { %v303_v39 = vadd.f32 %v546_v33, %v302_v37 }
 0x16c   : > { %v307_v41 = vsel %vm306_vm4, %v546_v33, %v303_v39 }
 0x16d   : > { %v312_v42 = vsel %vm309_vm5, %v311_v40, %v307_v41 }
 0x16e   : > { %v313_v43 = vmul.f32 %v312_v42, %v281_v19 }
 0x170   : > { %v315_v44 = vrot.slane %v313_v43, 4  ;;  %314 = vst [vmem:[%s241_s27] sm:$0xff] %v313_v43 }
 0x171   : > { %634 = shalt.err (!%p631_p9)
}
 0x172   : > { %485 = dma.vmem_to_hbm [thread:$0]  (%p799_p13), %s354_s28, 128, %s356_s30, %s328_s5   ;;  %v316_v45 = vadd.f32 %v315_v44, %v313_v43 }
 0x173   : > { %s337_s24 = scalar_lea.hbm %s904_s3, %s763_s22  ;;  %s234_s25 = scalar_lea.vmem [#allocation7], %s830_s9 }
 0x174   : > { %v317_v46 = vrot.slane %v316_v45, 2  ;;  %s339_s26 = sshll.u32 %s234_s25, 4  ;;  %s341_s27 = sshll.u32 %s337_s24, 4  ;;  %s340_s26 = int_to_ptr.vmem [resolvable:$true] %s339_s26  ;;  %s342_s27 = int_to_ptr.hbm [resolvable:$true] %s341_s27 }
 0x175   : > { %s324_s11 = scalar_lea.sflag [#allocation4], %s830_s9  ;;  %s649_s12 = sshra.s32 %s342_s27, 4  ;;  %s650_s12 = int_to_ptr.hbm [resolvable:$true] %s649_s12 }
 0x176   : > { %v318_v47 = vadd.f32 %v317_v46, %v316_v45  ;;  %s651_s28 = scalar_lea.hbm %s650_s12, 1  ;;  %s655_s22 = scalar_lea.hbm %s904_s3, 2 }
 0x177   : > { %p652_p10 = scmp.ne.s32.totalorder %s650_s12, %s651_s28  ;;  %p656_p2 = scmp.lt.s32.totalorder %s650_s12, %s904_s3 }
 0x178   : > { %v319_v48 = vrot.slane %v318_v47, 1  ;;  %p657_p6 = scmp.lt.s32.totalorder %s655_s22, %s651_s28 }
 0x179   : > { %p653_p11 = pnand %p652_p10, %p799_p13 }
 0x17a   : > { %v320_v49 = vadd.f32 %v319_v48, %v318_v47  ;;  %p658_p1 = por %p657_p6, %p656_p2 }
 0x17b   : > { %p654_p0 = pneg %p653_p11 }
 0x17c   : > { %v321_v50 = vmul.f32 0.125, %v320_v49 }
 0x17d   : > { %p659_p3 = pnand %p658_p1, %p654_p0 }
 0x17e   : > { %322 = vst [vmem:[%s234_s25] sm:$0x1] %v321_v50 }
 0x17f   : > { %662 = shalt.err (!%p659_p3)
}
 0x180   : > { %484 = dma.vmem_to_hbm [thread:$0]  (%p799_p13), %s340_s26, 16, %s342_s27, %s324_s11  }
 0x181 PF: > { %s367_s9 = sand.u32 1, %s697_s15   ;;  %p911_p5 = scmp.ge.s32.totalorder %s709_s18, 2 }
 0x182   : > { %s368_s19 = scalar_lea.sflag [#allocation4], %s367_s9 }
 0x183   : > { %p497_p12 = pnand %p911_p5, %p804_p4 }
 0x185   : > { %p498_p8 = pneg %p497_p12 }
 0x187   : > { %688 = dma.done.wait (%p498_p8), %s368_s19, 16  }
 0x188   : > { %690 = vsyncadd (%p498_p8), %s368_s19, 4294967280  ;;  %s377_s21 = scalar_lea.sflag [#allocation9], %s367_s9 }
 0x189   : > { %692 = dma.done.wait (%p498_p8), %s377_s21, 128  }
 0x18a   : > { %694 = vsyncadd (%p498_p8), %s377_s21, 4294967168  ;;  %p22_p13 = scmp.ge.s32.totalorder %s779_s29, 4   ;;  %s912_s15 = smov %s701_s16 }
 0x18b   : > { %s913_s16 = smov %s705_s17  ;;  %s914_s17 = smov %s791_s6 }
 0x18c   : > { %s915_s18 = smov %s779_s29  ;;  %24 = sbr.rel (!%p22_p13) target bundleno = 8 (0x8), region = 98 }
 0x191   :  { %383 = vsyncpa [#allocation3], 1 }
 0x192   :  { %385 = vsyncpa [#allocation3 + $0x1], 1 }
 0x193   :  { %386 = vsyncpa [#allocation6], 1 }
 0x194   :  { %387 = vsyncpa [#allocation4], 1 }
 0x195   :  { %389 = vsyncpa [#allocation4 + $0x1], 1 }
 0x196   :  { %390 = vsyncpa [#allocation9], 1 }
 0x197   :  { %392 = vsyncpa [#allocation9 + $0x1], 1 }

// kernel: tpu_custom_call.1
= control target key start
LH: loop header
LB: loop body
LE: loop exit
PB: predicated region body
PF: predicated region fallthrough
CT: control target
= control target key end

     0   :  { %10 = vsyncpa [#allocation3], 0  ;;  %s901_s0 = inlined_call_operand.hbm [shape: f32[16,128], index: 0, kind: input, shape index: {}]   ;;  %s902_s1 = inlined_call_operand.hbm [shape: f32[128,128], index: 1, kind: input, shape index: {}]   ;;  %s903_s2 = inlined_call_operand.vmem [shape: f32[1,128], index: 2, kind: input, shape index: {}]   ;;  %s904_s3 = inlined_call_operand.hbm [shape: f32[2,1,128], index: 3, kind: output, shape index: {0}]   ;;  %s905_s4 = inlined_call_operand.hbm [shape: f32[2,8,128], index: 4, kind: output, shape index: {1}]  }
   0x1   :  { %12 = vsyncpa [#allocation3 + $0x1], 0 }
   0x2   :  { %13 = vsyncpa [#allocation6], 0 }
   0x3   :  { %14 = vsyncpa [#allocation4], 0 }
   0x4   :  { %16 = vsyncpa [#allocation4 + $0x1], 0 }
   0x5   :  { %17 = vsyncpa [#allocation9], 0 }
   0x6   :  { %19 = vsyncpa [#allocation9 + $0x1], 0  ;;  %s739_s15 = smov 0   ;;  %s741_s16 = smov 0  }
   0x7   :  { %s743_s17 = smov 0   ;;  %s745_s18 = smov 0  }
   0x8 LB: > { %s161_s21 = sshll.u32 %s902_s1, 4  ;;  %s763_s22 = sadd.s32 4294967295, %s709_s18   ;;  %s709_s18 = sphi %s745_s18, %s915_s18   ;;  %s705_s17 = sphi %s743_s17, %s914_s17   ;;  %s701_s16 = sphi %s741_s16, %s913_s16   ;;  %s697_s15 = sphi %s739_s15, %s912_s15   ;;  %s162_s21 = int_to_ptr.hbm [resolvable:$true] %s161_s21 }
   0x9   : > { %p465_p0 = scmp.ge.s32.totalorder %s709_s18, 1  ;;  %p46_p1 = scmp.eq.s32.totalorder %s763_s22, 0 }
   0xa   : > { %p150_p2 = scmp.lt.s32.totalorder %s709_s18, 3  ;;  %s711_s24 = smov [#allocation5]  }
   0xb   : > { %s163_s25 = sshll.u32 %s711_s24, 4  ;;  %s712_s26 = smov 128   ;;  %s164_s25 = int_to_ptr.vmem [resolvable:$true] %s163_s25 }
   0xc   : > { %p768_p3 = pnand %p465_p0, %p150_p2  ;;  %s713_s27 = smov 8  }
   0xd   : > { %s464_s28 = sadd.s32 4294967294, %s709_s18   ;;  %s779_s29 = sadd.s32 1, %s709_s18  }
   0xe   : > { %p488_p4 = pneg %p768_p3  ;;  %s32_s30 = sadd.s32 1, %s705_s17 }
   0xf   : > { %s29_s5 = ssub.s32 %s709_s18, %s779_s29  ;;  %p39_p7 = scmp.ne.s32.totalorder %s705_s17, %s701_s16 }
  0x10   : > { %p489_p6 = pnand %p488_p4, %p46_p1  ;;  %p30_p8 = scmp.eq.s32.totalorder %s29_s5, 0 }
  0x11   : > { %p40_p9 = scmp.eq.s32.totalorder %s709_s18, 0  ;;  %p45_p10 = scmp.ne.s32.totalorder %s701_s16, %s697_s15 }
  0x12   : > { %491 = dma.hbm_to_vmem [thread:$0]  (!%p489_p6), %s162_s21, 2048, %s164_s25, [#allocation6], %s712_s26, %s712_s26, %s713_s27  }
  0x13   : > { %p111_p11 = scmp.eq.s32.totalorder %s763_s22, 1  ;;  %p795_p12 = por %p46_p1, %p45_p10 }
  0x14   : > { %s791_s6 = scalar_select %p30_p8, %s705_s17, %s32_s30  }
  0x15   : > { %p799_p13 = por %p111_p11, %p39_p7  ;;  %p117_p0 = scmp.eq.s32.totalorder %s464_s28, 1 }
  0x16   : > { %p41_p2 = por %p40_p9, %p39_p7  ;;  %s180_s9 = sand.u32 1, %s705_s17  }
  0x17   : > { %p804_p4 = por %p117_p0, %p45_p10  ;;  %p504_p6 = scmp.lt.s32.totalorder %s709_s18, 2 }
  0x18   : > { %s468_s11 = sshll.u32 %s180_s9, 3  ;;  %s469_s12 = sshll.u32 %s709_s18, 3 }
  0x19   : > { %s188_s19 = scalar_lea.hbm %s901_s0, %s469_s12  ;;  %s184_s21 = scalar_lea.vmem [#allocation2], %s468_s11 }
  0x1a   : > { %s190_s20 = sshll.u32 %s188_s19, 4  ;;  %s192_s24 = sshll.u32 %s184_s21, 4  ;;  %s191_s20 = int_to_ptr.hbm [resolvable:$true] %s190_s20  ;;  %s193_s24 = int_to_ptr.vmem [resolvable:$true] %s192_s24 }
  0x1b   : > { %p813_p8 = pnand %p504_p6, %p41_p2  ;;  %s181_s26 = scalar_lea.sflag [#allocation3], %s180_s9 }
  0x1c   : > { %s577_s27 = sshra.s32 %s191_s20, 4  ;;  %s584_s11 = scalar_lea.hbm %s901_s0, 16  ;;  %s578_s27 = int_to_ptr.hbm [resolvable:$true] %s577_s27 }
  0x1d   : > { %s579_s28 = scalar_lea.hbm %s578_s27, 8  ;;  %p581_p9 = pneg %p813_p8 }
  0x1e   : > { %p580_p7 = scmp.ne.s32.totalorder %s578_s27, %s579_s28  ;;  %p585_p0 = scmp.lt.s32.totalorder %s578_s27, %s901_s0 }
  0x1f   : > { %p586_p2 = scmp.lt.s32.totalorder %s584_s11, %s579_s28 }
  0x20   : > { %p582_p10 = pnand %p581_p9, %p580_p7 }
  0x21   : > { %p587_p6 = por %p586_p2, %p585_p0 }
  0x22   : > { %p583_p11 = pneg %p582_p10 }
  0x24   : > { %p588_p5 = pnand %p587_p6, %p583_p11 }
  0x26   : > { %591 = shalt.err (!%p588_p5)
}
  0x27   : > { %495 = dma.hbm_to_vmem [thread:$0]  (!%p813_p8), %s191_s20, 128, %s193_s24, %s181_s26  }
  0x28   : > { %201 = sbr.rel (%p768_p3) target bundleno = 385 (0x181), region = 32  ;;  %s830_s9 = sand.u32 (!%p768_p3), 1, %s701_s16  }
  0x29   : > { %s471_s14 = sshll.u32 (!%p768_p3), %s830_s9, 3  ;;  %s204_s19 = scalar_lea.sflag (!%p768_p3), [#allocation3], %s830_s9 }
  0x2a   : > { %s836_s21 = scalar_lea.vmem (!%p768_p3), [#allocation2], %s471_s14 }
  0x2d   : > { %680 = dma.done.wait (%p795_p12), %s204_s19, 128  }
  0x2e   : > { %682 = vsyncadd (%p795_p12), %s204_s19, 4294967168 }
  0x2f   : > { %684 = dma.done.wait (%p46_p1), [#allocation6], 2048  }
  0x30   : > { %686 = vsyncadd (%p46_p1), [#allocation6], 4294965248  ;;  %v258_v0 = vld [vmem:[#allocation5 + $0x78] sm:$0xff]  ;;  %v257_v1 = vld [vmem:[#allocation5 + $0x70] sm:$0xff]  ;;  %s475_s20 = sshll.u32 %s763_s22, 3  ;;  %s241_s27 = scalar_lea.vmem [#allocation8], %s471_s14 }
  0x31   : > { %263 = vmatpush.msra.mxu0 %v258_v0  ;;  %v256_v2 = vld [vmem:[#allocation5 + $0x68] sm:$0xff]  ;;  %v255_v3 = vld [vmem:[#allocation5 + $0x60] sm:$0xff]  ;;  %v254_v4 = vld [vmem:[#allocation5 + $0x58] sm:$0xff]  ;;  %s351_s26 = scalar_lea.hbm %s905_s4, %s475_s20  ;;  %s353_s28 = sshll.u32 %s241_s27, 4  ;;  %s354_s28 = int_to_ptr.vmem [resolvable:$true] %s353_s28 }
  0x32   : > { %v253_v5 = vld [vmem:[#allocation5 + $0x50] sm:$0xff]  ;;  %v252_v6 = vld [vmem:[#allocation5 + $0x48] sm:$0xff]  ;;  %v251_v7 = vld [vmem:[#allocation5 + $0x40] sm:$0xff]  ;;  %s355_s30 = sshll.u32 %s351_s26, 4  ;;  %s328_s5 = scalar_lea.sflag [#allocation9], %s830_s9  ;;  %s356_s30 = int_to_ptr.hbm [resolvable:$true] %s355_s30 }
  0x33   : > { %264 = vmatpush.msra.mxu0 %v257_v1  ;;  %v250_v8 = vld [vmem:[#allocation5 + $0x38] sm:$0xff]  ;;  %v249_v9 = vld [vmem:[#allocation5 + $0x30] sm:$0xff]  ;;  %v248_v10 = vld [vmem:[#allocation5 + $0x28] sm:$0xff]  ;;  %s621_s11 = sshra.s32 %s356_s30, 4  ;;  %s627_s19 = scalar_lea.hbm %s905_s4, 16  ;;  %s622_s11 = int_to_ptr.hbm [resolvable:$true] %s621_s11 }
  0x34   : > { %v247_v11 = vld [vmem:[#allocation5 + $0x20] sm:$0xff]  ;;  %v246_v12 = vld [vmem:[#allocation5 + $0x18] sm:$0xff]  ;;  %v245_v13 = vld [vmem:[#allocation5 + $0x10] sm:$0xff]  ;;  %s623_s12 = scalar_lea.hbm %s622_s11, 8  ;;  %p628_p12 = scmp.lt.s32.totalorder %s622_s11, %s905_s4 }
  0x35   : > { %265 = vmatpush.msra.mxu0 %v256_v2  ;;  %v244_v14 = vld [vmem:[#allocation5 + $0x8] sm:$0xff]  ;;  %v243_v15 = vld [vmem:[#allocation5] sm:$0xff]  ;;  %v242_v16 = vld [vmem:[%s836_s21] sm:$0xff]  ;;  %p624_p1 = scmp.ne.s32.totalorder %s622_s11, %s623_s12  ;;  %p629_p8 = scmp.lt.s32.totalorder %s627_s19, %s623_s12 }
  0x36   : > { %v542_v17 = vld [vmem:[%s903_s2] ss:$0 sm:$0xff] }
  0x37   : > { %266 = vmatpush.msra.mxu0 %v255_v3  ;;  %p625_p3 = pnand %p624_p1, %p799_p13  ;;  %p630_p7 = por %p629_p8, %p628_p12 }
  0x39   : > { %267 = vmatpush.msra.mxu0 %v254_v4  ;;  %p626_p5 = pneg %p625_p3 }
  0x3b   : > { %268 = vmatpush.msra.mxu0 %v253_v5  ;;  %p631_p9 = pnand %p630_p7, %p626_p5 }
  0x3d   : > { %269 = vmatpush.msra.mxu0 %v252_v6 }
  0x3f   : > { %270 = vmatpush.msra.mxu0 %v251_v7 }
  0x41   : > { %271 = vmatpush.msra.mxu0 %v250_v8 }
  0x43   : > { %272 = vmatpush.msra.mxu0 %v249_v9 }
  0x45   : > { %273 = vmatpush.msra.mxu0 %v248_v10 }
  0x47   : > { %274 = vmatpush.msra.mxu0 %v247_v11 }
  0x49   : > { %275 = vmatpush.msra.mxu0 %v246_v12 }
  0x4b   : > { %276 = vmatpush.msra.mxu0 %v245_v13 }
  0x4d   : > { %277 = vmatpush.msra.mxu0 %v244_v14 }
  0x4f   : > { %278 = vmatpush.msra.mxu0 %v243_v15 }
  0x50   : > { %279 = vmatmul.f32.vlgmr.msra.gmra.mxu0 %v242_v16 }
  0xcd   : > { %v280_v18 = vpop.f32.mrf.mxu0 }
  0xce   : > { %v281_v19 = vadd.f32 %v542_v17, %v280_v18 }
  0xd0   : > { %v283_v20 = vmul.f32 %v281_v19, %v281_v19 }
  0xd2   : > { %284 = vadd.xlane.f32.xlu0 %v283_v20 }
 0x145   : > { %v285_v21 = vpop.xlane.xlu0 %284 }
 0x146   : > { %543 = vrsqrt.f32 %v285_v21  ;;  %vm293_vm0 = vcmp.eq.f32.partialorder %v285_v21, inf  ;;  %v296_v29 = vand.u32 2147483648, %v285_v21  ;;  %vm295_vm1 = vcmp.eq.f32.partialorder %v285_v21, 0.0 }
 0x14c   : > { %v544_v22 = vpop.eup %543 }
 0x14d   : > { %v287_v23 = vmul.f32 %v544_v22, %v285_v21 }
 0x14f   : > { %v288_v24 = vmul.f32 %v544_v22, %v287_v23 }
 0x151   : > { %v289_v25 = vmul.f32 0.5, %v288_v24 }
 0x153   : > { %v290_v26 = vsub.f32 1.5, %v289_v25 }
 0x155   : > { %v291_v27 = vmul.f32 %v544_v22, %v290_v26 }
 0x157   : > { %v292_v28 = vmul.f32 %v291_v27, %v285_v21 }
 0x159   : > { %v294_v30 = vsel %vm293_vm0, %v285_v21, %v292_v28 }
 0x15a   : > { %v297_v31 = vsel %vm295_vm1, %v296_v29, %v294_v30 }
 0x15b   : > { %v298_v32 = vadd.f32 1e-08, %v297_v31 }
 0x15d   : > { %545 = vrcp.f32 %v298_v32  ;;  %v310_v36 = vand.u32 2147483648, %v298_v32  ;;  %v308_v38 = vand.u32 2147483647, %v298_v32  ;;  %vm304_vm3 = vweird.f32 %v298_v32 }
 0x15f   : > { %v311_v40 = vor.u32 1.1754944e-38, %v310_v36  ;;  %vm309_vm5 = vcmp.eq.f32.partialorder %v308_v38, 8.507059e+37 }
 0x163   : > { %v546_v33 = vpop.eup %545 }
 0x164   : > { %v300_v34 = vmul.f32 %v546_v33, %v298_v32  ;;  %vm305_vm2 = vweird.f32 %v546_v33 }
 0x165   : > { %vm306_vm4 = vmor %vm304_vm3, %vm305_vm2 }
 0x166   : > { %v301_v35 = vsub.f32 1.0, %v300_v34 }
 0x168   : > { %v302_v37 = vmul.f32 %v546_v33, %v301_v35 }
 0x16a   : > { %v303_v39 = vadd.f32 %v546_v33, %v302_v37 }
 0x16c   : > { %v307_v41 = vsel %vm306_vm4, %v546_v33, %v303_v39 }
 0x16d   : > { %v312_v42 = vsel %vm309_vm5, %v311_v40, %v307_v41 }
 0x16e   : > { %v313_v43 = vmul.f32 %v312_v42, %v281_v19 }
 0x170   : > { %v315_v44 = vrot.slane %v313_v43, 4  ;;  %314 = vst [vmem:[%s241_s27] sm:$0xff] %v313_v43 }
 0x171   : > { %634 = shalt.err (!%p631_p9)
}
 0x172   : > { %485 = dma.vmem_to_hbm [thread:$0]  (%p799_p13), %s354_s28, 128, %s356_s30, %s328_s5   ;;  %v316_v45 = vadd.f32 %v315_v44, %v313_v43 }
 0x173   : > { %s337_s24 = scalar_lea.hbm %s904_s3, %s763_s22  ;;  %s234_s25 = scalar_lea.vmem [#allocation7], %s830_s9 }
 0x174   : > { %v317_v46 = vrot.slane %v316_v45, 2  ;;  %s339_s26 = sshll.u32 %s234_s25, 4  ;;  %s341_s27 = sshll.u32 %s337_s24, 4  ;;  %s340_s26 = int_to_ptr.vmem [resolvable:$true] %s339_s26  ;;  %s342_s27 = int_to_ptr.hbm [resolvable:$true] %s341_s27 }
 0x175   : > { %s324_s11 = scalar_lea.sflag [#allocation4], %s830_s9  ;;  %s649_s12 = sshra.s32 %s342_s27, 4  ;;  %s650_s12 = int_to_ptr.hbm [resolvable:$true] %s649_s12 }
 0x176   : > { %v318_v47 = vadd.f32 %v317_v46, %v316_v45  ;;  %s651_s28 = scalar_lea.hbm %s650_s12, 1  ;;  %s655_s22 = scalar_lea.hbm %s904_s3, 2 }
 0x177   : > { %p652_p10 = scmp.ne.s32.totalorder %s650_s12, %s651_s28  ;;  %p656_p2 = scmp.lt.s32.totalorder %s650_s12, %s904_s3 }
 0x178   : > { %v319_v48 = vrot.slane %v318_v47, 1  ;;  %p657_p6 = scmp.lt.s32.totalorder %s655_s22, %s651_s28 }
 0x179   : > { %p653_p11 = pnand %p652_p10, %p799_p13 }
 0x17a   : > { %v320_v49 = vadd.f32 %v319_v48, %v318_v47  ;;  %p658_p1 = por %p657_p6, %p656_p2 }
 0x17b   : > { %p654_p0 = pneg %p653_p11 }
 0x17c   : > { %v321_v50 = vmul.f32 0.125, %v320_v49 }
 0x17d   : > { %p659_p3 = pnand %p658_p1, %p654_p0 }
 0x17e   : > { %322 = vst [vmem:[%s234_s25] sm:$0x1] %v321_v50 }
 0x17f   : > { %662 = shalt.err (!%p659_p3)
}
 0x180   : > { %484 = dma.vmem_to_hbm [thread:$0]  (%p799_p13), %s340_s26, 16, %s342_s27, %s324_s11  }
 0x181 PF: > { %s367_s9 = sand.u32 1, %s697_s15   ;;  %p911_p5 = scmp.ge.s32.totalorder %s709_s18, 2 }
 0x182   : > { %s368_s19 = scalar_lea.sflag [#allocation4], %s367_s9 }
 0x183   : > { %p497_p12 = pnand %p911_p5, %p804_p4 }
 0x185   : > { %p498_p8 = pneg %p497_p12 }
 0x187   : > { %688 = dma.done.wait (%p498_p8), %s368_s19, 16  }
 0x188   : > { %690 = vsyncadd (%p498_p8), %s368_s19, 4294967280  ;;  %s377_s21 = scalar_lea.sflag [#allocation9], %s367_s9 }
 0x189   : > { %692 = dma.done.wait (%p498_p8), %s377_s21, 128  }
 0x18a   : > { %694 = vsyncadd (%p498_p8), %s377_s21, 4294967168  ;;  %p22_p13 = scmp.ge.s32.totalorder %s779_s29, 4   ;;  %s912_s15 = smov %s701_s16 }
 0x18b   : > { %s913_s16 = smov %s705_s17  ;;  %s914_s17 = smov %s791_s6 }
 0x18c   : > { %s915_s18 = smov %s779_s29  ;;  %24 = sbr.rel (!%p22_p13) target bundleno = 8 (0x8), region = 98 }
 0x191   :  { %383 = vsyncpa [#allocation3], 1 }
 0x192   :  { %385 = vsyncpa [#allocation3 + $0x1], 1 }
 0x193   :  { %386 = vsyncpa [#allocation6], 1 }
 0x194   :  { %387 = vsyncpa [#allocation4], 1 }
 0x195   :  { %389 = vsyncpa [#allocation4 + $0x1], 1 }
 0x196   :  { %390 = vsyncpa [#allocation9], 1 }
 0x197   :  { %392 = vsyncpa [#allocation9 + $0x1], 1 }

</bundles_post_ra>
